<compile_context>
chip_gen: v5e
topology: v5e:2x2
jax: 0.10.0
libtpu: 0.0.40
codegen_flags: <defaults>
</compile_context>

<pallas_src>
import math

import jax
import jax.numpy as jnp
from jax.experimental import pallas as pl
from jax.experimental.pallas import tpu as pltpu


def _round_up(v, m):
    return ((v + m - 1) // m) * m


def _pick_tile(hp):
    # hp is already a multiple of 128; pick the largest convenient tile.
    for t in (512, 256, 128):
        if hp % t == 0:
            return t
    return hp


def _lstm_cell_kernel(xh_ref, cx_ref, w_ref, b_ref, h_out_ref, c_out_ref):
    """One hidden tile: gates = b + [x,hx] @ W_tile, then LSTM gate math.

    Shapes seen by the kernel (per grid step j over hidden tiles):
      xh_ref : [Bp, Kp]        (same block every step; K = input + hidden, padded)
      cx_ref : [Bp, tn]
      w_ref  : [Kp, 4*tn]      (tile-local i|f|g|o columns, contiguous)
      b_ref  : [1, 4*tn]
      h_out  : [Bp, tn]
      c_out  : [Bp, tn]  (float32)
    """
    tn = cx_ref.shape[1]

    # Single fused MXU matmul, f32 accumulation; bias folded into the init.
    gates = b_ref[...].astype(jnp.float32) + jnp.dot(
        xh_ref[...], w_ref[...], preferred_element_type=jnp.float32)

    i_t = jax.nn.sigmoid(gates[:, 0 * tn:1 * tn])
    f_t = jax.nn.sigmoid(gates[:, 1 * tn:2 * tn])
    g_t = jnp.tanh(gates[:, 2 * tn:3 * tn])
    o_t = jax.nn.sigmoid(gates[:, 3 * tn:4 * tn])

    cx = cx_ref[...].astype(jnp.float32)
    c_t = f_t * cx + i_t * g_t
    h_t = o_t * jnp.tanh(c_t)

    h_out_ref[...] = h_t.astype(h_out_ref.dtype)
    c_out_ref[...] = c_t  # keep cell state in float32


def lstm_cell(x, hx, cx, wx, wh, b):
    """One LSTM cell step.  Returns (h_t, c_t).

    x  : [B, input_size]
    hx : [B, H]
    cx : [B, H]
    wx : [input_size, 4H]   (pre-transposed from PyTorch's [4H, in])
    wh : [H, 4H]
    b  : [1, 4H]            (bias_x + bias_h, combined)
    """
    B, input_size = x.shape
    H = hx.shape[1]
    K = input_size + H

    # --- padding / tiling decisions (lane-dense layout) ---------------------
    Bp = _round_up(B, 8)
    Hp = _round_up(H, 128)
    Kp = _round_up(K, 128)
    tn = _pick_tile(Hp)
    nt = Hp // tn

    f32 = jnp.float32

    # --- one-time weight / bias repacking (would be cached in real use) -----
    # Combined weight [K, 4H] -> per-tile layout [Kp, nt * (4*tn)] where the
    # columns of tile j are (i|f|g|o) restricted to hidden units j*tn:(j+1)*tn.
    w = jnp.concatenate([wx, wh], axis=0).reshape(K, 4, H)
    w = jnp.pad(w, ((0, Kp - K), (0, 0), (0, Hp - H)))
    w_packed = (w.reshape(Kp, 4, nt, tn)
                 .transpose(0, 2, 1, 3)
                 .reshape(Kp, nt * 4 * tn))

    bb = b.reshape(1, 4, H)
    bb = jnp.pad(bb, ((0, 0), (0, 0), (0, Hp - H)))
    b_packed = (bb.reshape(1, 4, nt, tn)
                  .transpose(0, 2, 1, 3)
                  .reshape(1, nt * 4 * tn))

    # --- activations: fused + padded ----------------------------------------
    xh = jnp.zeros((Bp, Kp), dtype=x.dtype)
    xh = xh.at[:B, :input_size].set(x).at[:B, input_size:K].set(hx)
    cx_p = jnp.zeros((Bp, Hp), dtype=cx.dtype).at[:B, :H].set(cx)

    # --- VMEM budget (explicit, bounded: portable to v7x's 64 MiB) ----------
    itemsize = 4
    per_tile = itemsize * (Bp * Kp + Kp * 4 * tn + 4 * tn + 3 * Bp * tn)
    vmem_limit = int(min(max(3 * per_tile + (1 << 20), 16 << 20), 48 << 20))

    h_pad, c_pad = pl.pallas_call(
        _lstm_cell_kernel,
        out_shape=(
            jax.ShapeDtypeStruct((Bp, Hp), x.dtype),
            jax.ShapeDtypeStruct((Bp, Hp), f32),
        ),
        grid_spec=pltpu.PrefetchScalarGridSpec(
            num_scalar_prefetch=0,
            grid=(nt,),
            in_specs=[
                pl.BlockSpec((Bp, Kp), lambda j: (0, 0)),        # xh (resident)
                pl.BlockSpec((Bp, tn), lambda j: (0, j)),        # cx tile
                pl.BlockSpec((Kp, 4 * tn), lambda j: (0, j)),    # weight tile
                pl.BlockSpec((1, 4 * tn), lambda j: (0, j)),     # bias tile
            ],
            out_specs=[
                pl.BlockSpec((Bp, tn), lambda j: (0, j)),        # h tile
                pl.BlockSpec((Bp, tn), lambda j: (0, j)),        # c tile
            ],
        ),
        compiler_params=pltpu.CompilerParams(
            dimension_semantics=("parallel",),
            vmem_limit_bytes=vmem_limit,
        ),
    )(xh, cx_p, w_packed, b_packed)

    return h_pad[:B, :H], c_pad[:B, :H]


def init_lstm_params(key, input_size, hidden_size, dtype=jnp.float32):
    """Deterministic init matching nn.Linear's U(-1/sqrt(fan_in), 1/sqrt(fan_in))."""
    kx_w, kx_b, kh_w, kh_b = jax.random.split(key, 4)
    bound_x = 1.0 / math.sqrt(input_size)
    bound_h = 1.0 / math.sqrt(hidden_size)
    # Stored pre-transposed: [in_features, 4*hidden]
    wx = jax.random.uniform(kx_w, (input_size, 4 * hidden_size),
                            minval=-bound_x, maxval=bound_x, dtype=dtype)
    bx = jax.random.uniform(kx_b, (4 * hidden_size,),
                            minval=-bound_x, maxval=bound_x, dtype=dtype)
    wh = jax.random.uniform(kh_w, (hidden_size, 4 * hidden_size),
                            minval=-bound_h, maxval=bound_h, dtype=dtype)
    bh = jax.random.uniform(kh_b, (4 * hidden_size,),
                            minval=-bound_h, maxval=bound_h, dtype=dtype)
    b = (bx + bh).reshape(1, 4 * hidden_size)
    return wx, wh, b


def lstm_cell_ref(x, hx, cx, wx, wh, b):
    """Pure-JAX reference mirroring the PyTorch module."""
    gates = x @ wx + hx @ wh + b
    i_t, f_t, g_t, o_t = jnp.split(gates, 4, axis=1)
    i_t, f_t, g_t, o_t = (jax.nn.sigmoid(i_t), jax.nn.sigmoid(f_t),
                          jnp.tanh(g_t), jax.nn.sigmoid(o_t))
    c_t = f_t * cx + i_t * g_t
    h_t = o_t * jnp.tanh(c_t)
    return h_t, c_t


if __name__ == "__main__":
    batch = 8
    input_size = 16
    hidden_size = 32

    key = jax.random.PRNGKey(0)
    k_param, k_x, k_h, k_c = jax.random.split(key, 4)

    wx, wh, b = init_lstm_params(k_param, input_size, hidden_size)
    x = jax.random.normal(k_x, (batch, input_size), dtype=jnp.float32)
    hx = jax.random.normal(k_h, (batch, hidden_size), dtype=jnp.float32)
    cx = jax.random.normal(k_c, (batch, hidden_size), dtype=jnp.float32)

    h_t, c_t = lstm_cell(x, hx, cx, wx, wh, b)
    jax.block_until_ready((h_t, c_t))

    h_ref, c_ref = lstm_cell_ref(x, hx, cx, wx, wh, b)
    assert h_t.shape == h_ref.shape and c_t.shape == c_ref.shape
    assert jnp.allclose(h_t, h_ref, atol=1e-5, rtol=1e-5)
    assert jnp.allclose(c_t, c_ref, atol=1e-5, rtol=1e-5)

    print("KERNEL_OK")
</pallas_src>

<mosaic_0001>
module attributes {stable_mosaic.version = 11 : i64} {
  func.func @_lstm_cell_kernel(%arg0: i32, %arg1: memref<8x128xf32, #tpu.memory_space<vmem>>, %arg2: memref<8x128xf32, #tpu.memory_space<vmem>>, %arg3: memref<128x512xf32, #tpu.memory_space<vmem>>, %arg4: memref<1x512xf32, #tpu.memory_space<vmem>>, %arg5: memref<8x128xf32, #tpu.memory_space<vmem>>, %arg6: memref<8x128xf32, #tpu.memory_space<vmem>>) attributes {dimension_semantics = [#tpu.dimension_semantics<parallel>], iteration_bounds = array<i64: 1>, scalar_prefetch = 0 : i64, scratch_operands = 0 : i64, tpu.core_type = #tpu.core_type<tc>, window_params = [{pipeline_mode = #tpu.pipeline_mode<synchronous>, transform_indices = @transform_0, window_bounds = array<i64: 8, 128>}, {transform_indices = @transform_1, window_bounds = array<i64: 8, 128>}, {transform_indices = @transform_2, window_bounds = array<i64: 128, 512>}, {transform_indices = @transform_3, window_bounds = array<i64: 1, 512>}, {transform_indices = @transform_4, window_bounds = array<i64: 8, 128>}, {transform_indices = @transform_5, window_bounds = array<i64: 8, 128>}]} {
    %c0 = arith.constant 0 : index
    %c0_0 = arith.constant 0 : index
    %0 = vector.load %arg4[%c0, %c0_0] : memref<1x512xf32, #tpu.memory_space<vmem>>, vector<1x512xf32>
    %c0_1 = arith.constant 0 : index
    %c0_2 = arith.constant 0 : index
    %1 = vector.load %arg1[%c0_1, %c0_2] : memref<8x128xf32, #tpu.memory_space<vmem>>, vector<8x128xf32>
    %c0_3 = arith.constant 0 : index
    %c0_4 = arith.constant 0 : index
    %2 = vector.load %arg3[%c0_3, %c0_4] : memref<128x512xf32, #tpu.memory_space<vmem>>, vector<128x512xf32>
    %cst = arith.constant dense<0.000000e+00> : vector<8x512xf32>
    %3 = tpu.matmul %1, %2, %cst {dimension_numbers = #tpu.dot_dimension_numbers<[1], [0], [0], [1], [0, 0, 1, 1], [], []>} : vector<8x128xf32>, vector<128x512xf32>, vector<8x512xf32> -> vector<8x512xf32>
    %4 = vector.broadcast %0 : vector<1x512xf32> to vector<8x512xf32>
    %5 = arith.addf %4, %3 : vector<8x512xf32>
    %6 = vector.extract_strided_slice %5 {offsets = [0, 0], sizes = [8, 128], strides = [1, 1]} : vector<8x512xf32> to vector<8x128xf32>
    %7 = arith.negf %6 : vector<8x128xf32>
    %8 = math.exp %7 : vector<8x128xf32>
    %cst_5 = arith.constant 1.000000e+00 : f32
    %9 = vector.broadcast %cst_5 : f32 to vector<8x128xf32>
    %10 = arith.addf %9, %8 : vector<8x128xf32>
    %11 = arith.divf %9, %10 : vector<8x128xf32>
    %12 = vector.extract_strided_slice %5 {offsets = [0, 128], sizes = [8, 128], strides = [1, 1]} : vector<8x512xf32> to vector<8x128xf32>
    %13 = arith.negf %12 : vector<8x128xf32>
    %14 = math.exp %13 : vector<8x128xf32>
    %cst_6 = arith.constant 1.000000e+00 : f32
    %15 = vector.broadcast %cst_6 : f32 to vector<8x128xf32>
    %16 = arith.addf %15, %14 : vector<8x128xf32>
    %17 = arith.divf %15, %16 : vector<8x128xf32>
    %18 = vector.extract_strided_slice %5 {offsets = [0, 256], sizes = [8, 128], strides = [1, 1]} : vector<8x512xf32> to vector<8x128xf32>
    %19 = math.tanh %18 : vector<8x128xf32>
    %20 = vector.extract_strided_slice %5 {offsets = [0, 384], sizes = [8, 128], strides = [1, 1]} : vector<8x512xf32> to vector<8x128xf32>
    %21 = arith.negf %20 : vector<8x128xf32>
    %22 = math.exp %21 : vector<8x128xf32>
    %cst_7 = arith.constant 1.000000e+00 : f32
    %23 = vector.broadcast %cst_7 : f32 to vector<8x128xf32>
    %24 = arith.addf %23, %22 : vector<8x128xf32>
    %25 = arith.divf %23, %24 : vector<8x128xf32>
    %c0_8 = arith.constant 0 : index
    %c0_9 = arith.constant 0 : index
    %26 = vector.load %arg2[%c0_8, %c0_9] : memref<8x128xf32, #tpu.memory_space<vmem>>, vector<8x128xf32>
    %27 = arith.mulf %17, %26 : vector<8x128xf32>
    %28 = arith.mulf %11, %19 : vector<8x128xf32>
    %29 = arith.addf %27, %28 : vector<8x128xf32>
    %30 = math.tanh %29 : vector<8x128xf32>
    %31 = arith.mulf %25, %30 : vector<8x128xf32>
    %c0_10 = arith.constant 0 : index
    %c0_11 = arith.constant 0 : index
    %32 = vector.load %arg5[%c0_10, %c0_11] : memref<8x128xf32, #tpu.memory_space<vmem>>, vector<8x128xf32>
    tpu.vector_store %arg5[%c0_10, %c0_11], %31 {strides = array<i32>} : memref<8x128xf32, #tpu.memory_space<vmem>>, vector<8x128xf32>,
    %c0_12 = arith.constant 0 : index
    %c0_13 = arith.constant 0 : index
    %33 = vector.load %arg6[%c0_12, %c0_13] : memref<8x128xf32, #tpu.memory_space<vmem>>, vector<8x128xf32>
    tpu.vector_store %arg6[%c0_12, %c0_13], %29 {strides = array<i32>} : memref<8x128xf32, #tpu.memory_space<vmem>>, vector<8x128xf32>,
    return
  }
  func.func @transform_0(%arg0: i32) -> (i32, i32) {
    %c0_i32 = arith.constant 0 : i32
    %c0_i32_0 = arith.constant 0 : i32
    %c0_i32_1 = arith.constant 0 : i32
    return %c0_i32, %c0_i32_0 : i32, i32
  }
  func.func @transform_1(%arg0: i32) -> (i32, i32) {
    %c0_i32 = arith.constant 0 : i32
    %c0_i32_0 = arith.constant 0 : i32
    return %c0_i32, %arg0 : i32, i32
  }
  func.func @transform_2(%arg0: i32) -> (i32, i32) {
    %c0_i32 = arith.constant 0 : i32
    %c0_i32_0 = arith.constant 0 : i32
    return %c0_i32, %arg0 : i32, i32
  }
  func.func @transform_3(%arg0: i32) -> (i32, i32) {
    %c0_i32 = arith.constant 0 : i32
    %c0_i32_0 = arith.constant 0 : i32
    return %c0_i32, %arg0 : i32, i32
  }
  func.func @transform_4(%arg0: i32) -> (i32, i32) {
    %c0_i32 = arith.constant 0 : i32
    %c0_i32_0 = arith.constant 0 : i32
    return %c0_i32, %arg0 : i32, i32
  }
  func.func @transform_5(%arg0: i32) -> (i32, i32) {
    %c0_i32 = arith.constant 0 : i32
    %c0_i32_0 = arith.constant 0 : i32
    return %c0_i32, %arg0 : i32, i32
  }
}

</mosaic_0001>

<bundles_post_ra>
// kernel: tpu_custom_call.1
= control target key start
LH: loop header
LB: loop body
LE: loop exit
PB: predicated region body
PF: predicated region fallthrough
CT: control target
= control target key end

     0   :  { %11 = vsyncpa [#allocation3], 0  ;;  %s575_s0 = inlined_call_operand.hbm [shape: f32[8,128], index: 0, kind: input, shape index: {}]   ;;  %s576_s1 = inlined_call_operand.hbm [shape: f32[8,128], index: 1, kind: input, shape index: {}]   ;;  %s577_s2 = inlined_call_operand.hbm [shape: f32[128,512], index: 2, kind: input, shape index: {}]   ;;  %s578_s3 = inlined_call_operand.hbm [shape: f32[1,512], index: 3, kind: input, shape index: {}]   ;;  %s579_s4 = inlined_call_operand.hbm [shape: f32[8,128], index: 4, kind: output, shape index: {0}]   ;;  %s580_s5 = inlined_call_operand.hbm [shape: f32[8,128], index: 5, kind: output, shape index: {1}]  }
   0x1   :  { %12 = vsyncpa [#allocation6], 0 }
   0x2   :  { %13 = vsyncpa [#allocation9], 0 }
   0x3   :  { %14 = vsyncpa [#allocation4], 0  ;;  %s32_s20 = sshll.u32 %s576_s1, 4  ;;  %s33_s20 = int_to_ptr.hbm [resolvable:$true] %s32_s20 }
   0x4   :  { %15 = vsyncpa [#allocation12], 0  ;;  %s519_s21 = smov [#allocation5]   ;;  %s21_s25 = sshll.u32 %s575_s0, 4  ;;  %s22_s25 = int_to_ptr.hbm [resolvable:$true] %s21_s25 }
   0x5   :  { %s34_s22 = sshll.u32 %s519_s21, 4  ;;  %s520_s26 = smov [#allocation2]   ;;  %s35_s22 = int_to_ptr.vmem [resolvable:$true] %s34_s22 }
   0x6   :  { %37 = dma.hbm_to_vmem [thread:$0]  %s33_s20, 128, %s35_s22, [#allocation6]  }
   0x7   :  { %s23_s27 = sshll.u32 %s520_s26, 4  ;;  %s42_s30 = sshll.u32 %s577_s2, 4  ;;  %s24_s27 = int_to_ptr.vmem [resolvable:$true] %s23_s27  ;;  %s43_s30 = int_to_ptr.hbm [resolvable:$true] %s42_s30 }
   0x8   :  { %26 = dma.hbm_to_vmem [thread:$0]  %s22_s25, 128, %s24_s27, [#allocation3]  }
   0x9   :  { %s521_s1 = smov [#allocation7]   ;;  %s56_s9 = sshll.u32 %s578_s3, 4  ;;  %s57_s9 = int_to_ptr.hbm [resolvable:$true] %s56_s9 }
   0xa   :  { %s44_s6 = sshll.u32 %s521_s1, 4  ;;  %s522_s10 = smov 512   ;;  %s45_s6 = int_to_ptr.vmem [resolvable:$true] %s44_s6 }
   0xb   :  { %s523_s0 = smov 32   ;;  %s524_s11 = smov [#allocation8]  }
   0xc   :  { %50 = dma.hbm_to_vmem [thread:$0]  %s43_s30, 8192, %s45_s6, [#allocation6], %s522_s10, %s522_s10, %s523_s0  }
   0xd   :  { %s58_s12 = sshll.u32 %s524_s11, 4  ;;  %s59_s12 = int_to_ptr.vmem [resolvable:$true] %s58_s12 }
   0xe   :  { %61 = dma.hbm_to_vmem [thread:$0]  %s57_s9, 64, %s59_s12, [#allocation9]  }
   0xf   :  { %509 = dma.done.wait [#allocation3], 128  }
  0x10   :  { %510 = vsyncadd [#allocation3], 4294967168 }
  0x11   :  { %511 = dma.done.wait [#allocation6], 8320  }
  0x12   :  { %512 = vsyncadd [#allocation6], 4294958976 }
  0x13   :  { %513 = dma.done.wait [#allocation9], 64  }
  0x14   :  { %514 = vsyncadd [#allocation9], 4294967232  ;;  %v140_v0 = vld [vmem:[#allocation7 + $0x1e0] sm:$0xff]  ;;  %v141_v1 = vld [vmem:[#allocation7 + $0x1e8] sm:$0xff]  ;;  %s525_s2 = smov [#allocation11]   ;;  %s321_s15 = sshll.u32 %s580_s5, 4  ;;  %s322_s15 = int_to_ptr.hbm [resolvable:$true] %s321_s15 }
  0x15   :  { %v143_v2 = vld [vmem:[#allocation7 + $0x1f8] sm:$0xff]  ;;  %144 = vmatpush.msra.mxu0 %v140_v0  ;;  %164 = vmatpush.msra.mxu1 %v141_v1  ;;  %v136_v3 = vld [vmem:[#allocation7 + $0x1c0] sm:$0xff]  ;;  %v137_v4 = vld [vmem:[#allocation7 + $0x1c8] sm:$0xff]  ;;  %s319_s3 = sshll.u32 %s525_s2, 4  ;;  %s526_s16 = smov [#allocation10]   ;;  %s320_s3 = int_to_ptr.vmem [resolvable:$true] %s319_s3 }
  0x16   :  { %v139_v5 = vld [vmem:[#allocation7 + $0x1d8] sm:$0xff]  ;;  %204 = vmatpush.msra.mxu3 %v143_v2  ;;  %v132_v6 = vld [vmem:[#allocation7 + $0x1a0] sm:$0xff]  ;;  %v133_v7 = vld [vmem:[#allocation7 + $0x1a8] sm:$0xff]  ;;  %s308_s17 = sshll.u32 %s526_s16, 4  ;;  %s310_s19 = sshll.u32 %s579_s4, 4  ;;  %s309_s17 = int_to_ptr.vmem [resolvable:$true] %s308_s17  ;;  %s311_s19 = int_to_ptr.hbm [resolvable:$true] %s310_s19 }
  0x17   :  { %145 = vmatpush.msra.mxu0 %v136_v3  ;;  %165 = vmatpush.msra.mxu1 %v137_v4  ;;  %v135_v8 = vld [vmem:[#allocation7 + $0x1b8] sm:$0xff]  ;;  %v128_v9 = vld [vmem:[#allocation7 + $0x180] sm:$0xff]  ;;  %v129_v10 = vld [vmem:[#allocation7 + $0x188] sm:$0xff] }
  0x18   :  { %205 = vmatpush.msra.mxu3 %v139_v5  ;;  %v131_v11 = vld [vmem:[#allocation7 + $0x198] sm:$0xff]  ;;  %v124_v12 = vld [vmem:[#allocation7 + $0x160] sm:$0xff]  ;;  %v125_v13 = vld [vmem:[#allocation7 + $0x168] sm:$0xff] }
  0x19   :  { %146 = vmatpush.msra.mxu0 %v132_v6  ;;  %166 = vmatpush.msra.mxu1 %v133_v7  ;;  %v127_v14 = vld [vmem:[#allocation7 + $0x178] sm:$0xff]  ;;  %v120_v15 = vld [vmem:[#allocation7 + $0x140] sm:$0xff]  ;;  %v121_v16 = vld [vmem:[#allocation7 + $0x148] sm:$0xff] }
  0x1a   :  { %206 = vmatpush.msra.mxu3 %v135_v8  ;;  %v142_v17 = vld [vmem:[#allocation7 + $0x1f0] sm:$0xff]  ;;  %v123_v18 = vld [vmem:[#allocation7 + $0x158] sm:$0xff]  ;;  %v116_v20 = vld [vmem:[#allocation7 + $0x120] sm:$0xff] }
  0x1b   :  { %147 = vmatpush.msra.mxu0 %v128_v9  ;;  %167 = vmatpush.msra.mxu1 %v129_v10  ;;  %v138_v19 = vld [vmem:[#allocation7 + $0x1d0] sm:$0xff]  ;;  %v117_v21 = vld [vmem:[#allocation7 + $0x128] sm:$0xff]  ;;  %v119_v22 = vld [vmem:[#allocation7 + $0x138] sm:$0xff] }
  0x1c   :  { %207 = vmatpush.msra.mxu3 %v131_v11  ;;  %184 = vmatpush.msra.mxu2 %v142_v17  ;;  %v134_v23 = vld [vmem:[#allocation7 + $0x1b0] sm:$0xff]  ;;  %v112_v24 = vld [vmem:[#allocation7 + $0x100] sm:$0xff]  ;;  %v113_v25 = vld [vmem:[#allocation7 + $0x108] sm:$0xff] }
  0x1d   :  { %148 = vmatpush.msra.mxu0 %v124_v12  ;;  %168 = vmatpush.msra.mxu1 %v125_v13  ;;  %v115_v26 = vld [vmem:[#allocation7 + $0x118] sm:$0xff]  ;;  %v130_v27 = vld [vmem:[#allocation7 + $0x190] sm:$0xff]  ;;  %v108_v28 = vld [vmem:[#allocation7 + $0xe0] sm:$0xff] }
  0x1e   :  { %208 = vmatpush.msra.mxu3 %v127_v14  ;;  %185 = vmatpush.msra.mxu2 %v138_v19  ;;  %v109_v29 = vld [vmem:[#allocation7 + $0xe8] sm:$0xff]  ;;  %v111_v30 = vld [vmem:[#allocation7 + $0xf8] sm:$0xff]  ;;  %v126_v31 = vld [vmem:[#allocation7 + $0x170] sm:$0xff] }
  0x1f   :  { %149 = vmatpush.msra.mxu0 %v120_v15  ;;  %169 = vmatpush.msra.mxu1 %v121_v16  ;;  %v104_v32 = vld [vmem:[#allocation7 + $0xc0] sm:$0xff]  ;;  %v105_v33 = vld [vmem:[#allocation7 + $0xc8] sm:$0xff]  ;;  %v107_v34 = vld [vmem:[#allocation7 + $0xd8] sm:$0xff] }
  0x20   :  { %209 = vmatpush.msra.mxu3 %v123_v18  ;;  %186 = vmatpush.msra.mxu2 %v134_v23  ;;  %v122_v35 = vld [vmem:[#allocation7 + $0x150] sm:$0xff]  ;;  %v100_v36 = vld [vmem:[#allocation7 + $0xa0] sm:$0xff]  ;;  %v101_v37 = vld [vmem:[#allocation7 + $0xa8] sm:$0xff] }
  0x21   :  { %150 = vmatpush.msra.mxu0 %v116_v20  ;;  %170 = vmatpush.msra.mxu1 %v117_v21  ;;  %v103_v38 = vld [vmem:[#allocation7 + $0xb8] sm:$0xff]  ;;  %v118_v39 = vld [vmem:[#allocation7 + $0x130] sm:$0xff]  ;;  %v96_v40 = vld [vmem:[#allocation7 + $0x80] sm:$0xff] }
  0x22   :  { %210 = vmatpush.msra.mxu3 %v119_v22  ;;  %187 = vmatpush.msra.mxu2 %v130_v27  ;;  %v97_v41 = vld [vmem:[#allocation7 + $0x88] sm:$0xff]  ;;  %v99_v42 = vld [vmem:[#allocation7 + $0x98] sm:$0xff]  ;;  %v114_v43 = vld [vmem:[#allocation7 + $0x110] sm:$0xff] }
  0x23   :  { %151 = vmatpush.msra.mxu0 %v112_v24  ;;  %171 = vmatpush.msra.mxu1 %v113_v25  ;;  %v92_v44 = vld [vmem:[#allocation7 + $0x60] sm:$0xff]  ;;  %v93_v45 = vld [vmem:[#allocation7 + $0x68] sm:$0xff]  ;;  %v95_v46 = vld [vmem:[#allocation7 + $0x78] sm:$0xff] }
  0x24   :  { %211 = vmatpush.msra.mxu3 %v115_v26  ;;  %188 = vmatpush.msra.mxu2 %v126_v31  ;;  %v110_v47 = vld [vmem:[#allocation7 + $0xf0] sm:$0xff]  ;;  %v88_v48 = vld [vmem:[#allocation7 + $0x40] sm:$0xff]  ;;  %v89_v49 = vld [vmem:[#allocation7 + $0x48] sm:$0xff] }
  0x25   :  { %152 = vmatpush.msra.mxu0 %v108_v28  ;;  %172 = vmatpush.msra.mxu1 %v109_v29  ;;  %v91_v50 = vld [vmem:[#allocation7 + $0x58] sm:$0xff]  ;;  %v106_v51 = vld [vmem:[#allocation7 + $0xd0] sm:$0xff]  ;;  %v84_v52 = vld [vmem:[#allocation7 + $0x20] sm:$0xff] }
  0x26   :  { %212 = vmatpush.msra.mxu3 %v111_v30  ;;  %189 = vmatpush.msra.mxu2 %v122_v35  ;;  %v85_v53 = vld [vmem:[#allocation7 + $0x28] sm:$0xff]  ;;  %v87_v54 = vld [vmem:[#allocation7 + $0x38] sm:$0xff]  ;;  %v102_v55 = vld [vmem:[#allocation7 + $0xb0] sm:$0xff] }
  0x27   :  { %153 = vmatpush.msra.mxu0 %v104_v32  ;;  %173 = vmatpush.msra.mxu1 %v105_v33  ;;  %v80_v56 = vld [vmem:[#allocation7] sm:$0xff]  ;;  %v81_v57 = vld [vmem:[#allocation7 + $0x8] sm:$0xff]  ;;  %v83_v58 = vld [vmem:[#allocation7 + $0x18] sm:$0xff] }
  0x28   :  { %213 = vmatpush.msra.mxu3 %v107_v34  ;;  %190 = vmatpush.msra.mxu2 %v118_v39  ;;  %v79_v59 = vld [vmem:[#allocation2] sm:$0xff]  ;;  %v78_v1 = vld [vmem:[#allocation8] sm:$0xf] }
  0x29   :  { %154 = vmatpush.msra.mxu0 %v100_v36  ;;  %174 = vmatpush.msra.mxu1 %v101_v37  ;;  %v98_v60 = vld [vmem:[#allocation7 + $0x90] sm:$0xff]  ;;  %v225_v2 = vperm.slane %v78_v1, 0  ;;  %v226_v3 = vperm.slane %v78_v1, 1  ;;  %v228_v10 = vperm.slane %v78_v1, 3  ;;  %v227_v18 = vperm.slane %v78_v1, 2 }
  0x2a   :  { %214 = vmatpush.msra.mxu3 %v103_v38  ;;  %191 = vmatpush.msra.mxu2 %v114_v43  ;;  %v94_v61 = vld [vmem:[#allocation7 + $0x70] sm:$0xff]  ;;  %v295_v43 = vld [vmem:[#allocation5] sm:$0xff] }
  0x2b   :  { %155 = vmatpush.msra.mxu0 %v96_v40  ;;  %175 = vmatpush.msra.mxu1 %v97_v41  ;;  %v90_v62 = vld [vmem:[#allocation7 + $0x50] sm:$0xff] }
  0x2c   :  { %215 = vmatpush.msra.mxu3 %v99_v42  ;;  %192 = vmatpush.msra.mxu2 %v110_v47  ;;  %v86_v63 = vld [vmem:[#allocation7 + $0x30] sm:$0xff] }
  0x2d   :  { %156 = vmatpush.msra.mxu0 %v92_v44  ;;  %176 = vmatpush.msra.mxu1 %v93_v45  ;;  %v82_v0 = vld [vmem:[#allocation7 + $0x10] sm:$0xff] }
  0x2e   :  { %216 = vmatpush.msra.mxu3 %v95_v46  ;;  %193 = vmatpush.msra.mxu2 %v106_v51 }
  0x2f   :  { %157 = vmatpush.msra.mxu0 %v88_v48  ;;  %177 = vmatpush.msra.mxu1 %v89_v49 }
  0x30   :  { %217 = vmatpush.msra.mxu3 %v91_v50  ;;  %194 = vmatpush.msra.mxu2 %v102_v55 }
  0x31   :  { %158 = vmatpush.msra.mxu0 %v84_v52  ;;  %178 = vmatpush.msra.mxu1 %v85_v53 }
  0x32   :  { %218 = vmatpush.msra.mxu3 %v87_v54  ;;  %195 = vmatpush.msra.mxu2 %v98_v60 }
  0x33   :  { %159 = vmatpush.msra.mxu0 %v80_v56  ;;  %179 = vmatpush.msra.mxu1 %v81_v57 }
  0x34   :  { %219 = vmatpush.msra.mxu3 %v83_v58  ;;  %160 = vmatmul.f32.vlgmr.msra.gmra.mxu0 %v79_v59 }
  0x35   :  { %180 = vmatmul.f32.vlgmr.msra.gmra.mxu1 %v79_v59  ;;  %220 = vmatmul.f32.vlgmr.msra.gmra.mxu3 %v79_v59 }
  0x36   :  { %196 = vmatpush.msra.mxu2 %v94_v61 }
  0x38   :  { %197 = vmatpush.msra.mxu2 %v90_v62 }
  0x3a   :  { %198 = vmatpush.msra.mxu2 %v86_v63 }
  0x3c   :  { %199 = vmatpush.msra.mxu2 %v82_v0 }
  0x3d   :  { %200 = vmatmul.f32.vlgmr.msra.gmra.mxu2 %v79_v59 }
  0xb1   :  { %v161_v4 = vpop.f32.mrf.mxu0 }
  0xb2   :  { %v233_v5 = vadd.f32 %v225_v2, %v161_v4  ;;  %v181_v6 = vpop.f32.mrf.mxu1 }
  0xb3   :  { %v234_v7 = vadd.f32 %v226_v3, %v181_v6 }
  0xb4   :  { %v338_v8 = vmul.f32 -1.442695, %v233_v5 }
  0xb5   :  { %v339_v9 = vmul.f32 -1.442695, %v234_v7 }
  0xb6   :  { %349 = vpow2.f32 %v338_v8 }
  0xb7   :  { %351 = vpow2.f32 %v339_v9 }
  0xb8   :  { %v221_v11 = vpop.f32.mrf.mxu3 }
  0xb9   :  { %v236_v12 = vadd.f32 %v228_v10, %v221_v11 }
  0xbb   :  { %v340_v13 = vmul.f32 -1.442695, %v236_v12 }
  0xbc   :  { %v350_v14 = vpop.eup %349 }
  0xbd   :  { %v352_v15 = vpop.eup %351  ;;  %v240_v16 = vadd.f32 1.0, %v350_v14  ;;  %353 = vpow2.f32 %v340_v13 }
  0xbe   :  { %v259_v17 = vadd.f32 1.0, %v352_v15 }
  0xbf   :  { %355 = vrcp.f32 %v240_v16  ;;  %v252_v29 = vand.u32 2147483648, %v240_v16  ;;  %v250_v32 = vand.u32 2147483647, %v240_v16  ;;  %vm246_vm2 = vweird.f32 %v240_v16 }
  0xc0   :  { %357 = vrcp.f32 %v259_v17  ;;  %v201_v19 = vpop.f32.mrf.mxu2  ;;  %v271_v30 = vand.u32 2147483648, %v259_v17  ;;  %v269_v34 = vand.u32 2147483647, %v259_v17  ;;  %vm265_vm3 = vweird.f32 %v259_v17 }
  0xc1   :  { %v235_v21 = vadd.f32 %v227_v18, %v201_v19  ;;  %v253_v39 = vor.u32 1.1754944e-38, %v252_v29  ;;  %vm251_vm6 = vcmp.eq.f32.partialorder %v250_v32, 8.507059e+37 }
  0xc2   :  { %v272_v41 = vor.u32 1.1754944e-38, %v271_v30  ;;  %vm270_vm7 = vcmp.eq.f32.partialorder %v269_v34, 8.507059e+37 }
  0xc3   :  { %v354_v20 = vpop.eup %353 }
  0xc4   :  { %v279_v22 = vadd.f32 1.0, %v354_v20 }
  0xc5   :  { %v356_v23 = vpop.eup %355 }
  0xc6   :  { %v358_v24 = vpop.eup %357  ;;  %v242_v25 = vmul.f32 %v356_v23, %v240_v16  ;;  %359 = vrcp.f32 %v279_v22  ;;  %vm247_vm0 = vweird.f32 %v356_v23  ;;  %v291_v53 = vand.u32 2147483648, %v279_v22 }
  0xc7   :  { %v261_v26 = vmul.f32 %v358_v24, %v259_v17  ;;  %361 = vtanh.f32 %v235_v21  ;;  %vm266_vm1 = vweird.f32 %v358_v24  ;;  %vm248_vm4 = vmor %vm246_vm2, %vm247_vm0  ;;  %vm285_vm9 = vweird.f32 %v279_v22 }
  0xc8   :  { %v243_v27 = vsub.f32 1.0, %v242_v25  ;;  %vm267_vm5 = vmor %vm265_vm3, %vm266_vm1  ;;  %v289_v54 = vand.u32 2147483647, %v279_v22  ;;  %v292_v56 = vor.u32 1.1754944e-38, %v291_v53 }
  0xc9   :  { %v262_v28 = vsub.f32 1.0, %v261_v26 }
  0xca   :  { %v244_v31 = vmul.f32 %v356_v23, %v243_v27  ;;  %vm290_vm11 = vcmp.eq.f32.partialorder %v289_v54, 8.507059e+37 }
  0xcb   :  { %v263_v33 = vmul.f32 %v358_v24, %v262_v28 }
  0xcc   :  { %v360_v35 = vpop.eup %359  ;;  %v245_v36 = vadd.f32 %v356_v23, %v244_v31 }
  0xcd   :  { %v362_v37 = vpop.eup %361  ;;  %v281_v38 = vmul.f32 %v360_v35, %v279_v22  ;;  %v264_v40 = vadd.f32 %v358_v24, %v263_v33  ;;  %vm286_vm8 = vweird.f32 %v360_v35 }
  0xce   :  { %v249_v42 = vsel %vm248_vm4, %v356_v23, %v245_v36  ;;  %vm287_vm10 = vmor %vm285_vm9, %vm286_vm8 }
  0xcf   :  { %v282_v44 = vsub.f32 1.0, %v281_v38  ;;  %v254_v45 = vsel %vm251_vm6, %v253_v39, %v249_v42  ;;  %v268_v46 = vsel %vm267_vm5, %v358_v24, %v264_v40 }
  0xd0   :  { %v273_v47 = vsel %vm270_vm7, %v272_v41, %v268_v46  ;;  %v297_v48 = vmul.f32 %v362_v37, %v254_v45 }
  0xd1   :  { %v296_v49 = vmul.f32 %v295_v43, %v273_v47  ;;  %v283_v50 = vmul.f32 %v360_v35, %v282_v44 }
  0xd3   :  { %v298_v51 = vadd.f32 %v297_v48, %v296_v49  ;;  %v284_v52 = vadd.f32 %v360_v35, %v283_v50 }
  0xd5   :  { %363 = vtanh.f32 %v298_v51  ;;  %302 = vst [vmem:[#allocation11] sm:$0xff] %v298_v51  ;;  %v288_v55 = vsel %vm287_vm10, %v360_v35, %v284_v52 }
  0xd6   :  { %324 = dma.vmem_to_hbm [thread:$0]  %s320_s3, 128, %s322_s15, [#allocation12]   ;;  %v293_v58 = vsel %vm290_vm11, %v292_v56, %v288_v55 }
  0xdb   :  { %v364_v57 = vpop.eup %363 }
  0xdc   :  { %v300_v59 = vmul.f32 %v364_v57, %v293_v58 }
  0xde   :  { %301 = vst [vmem:[#allocation10] sm:$0xff] %v300_v59 }
  0xdf   :  { %313 = dma.vmem_to_hbm [thread:$0]  %s309_s17, 128, %s311_s19, [#allocation4]  }
  0xe0   :  { %515 = dma.done.wait [#allocation4], 128  }
  0xe1   :  { %516 = vsyncadd [#allocation4], 4294967168 }
  0xe2   :  { %517 = dma.done.wait [#allocation12], 128  }
  0xe3   :  { %518 = vsyncadd [#allocation12], 4294967168 }
  0xe4   :  { %333 = vsyncpa [#allocation3], 1 }
  0xe5   :  { %334 = vsyncpa [#allocation6], 1 }
  0xe6   :  { %335 = vsyncpa [#allocation9], 1 }
  0xe7   :  { %336 = vsyncpa [#allocation4], 1 }
  0xe8   :  { %337 = vsyncpa [#allocation12], 1 }

</bundles_post_ra>
